<compile_context>
chip_gen: v5e
topology: v5e:2x2
jax: 0.10.0
libtpu: 0.0.40
codegen_flags: <defaults>
</compile_context>

<pallas_src>
import functools

import jax
import jax.numpy as jnp
from jax.experimental import pallas as pl
from jax.experimental.pallas import tpu as pltpu

LANE = 128  # vreg lane width (same on v5e/v6e/v7x)


def _round_up(x, m):
    return (x + m - 1) // m * m


def sage_layer_kernel(e_ref, inv_deg_ref, h_self_ref, h_src_ref,
                      w_self_ref, w_neigh_ref, b_ref, o_ref, acc_ref,
                      *, tm, n_valid, apply_relu):
    """One SAGEConv layer, tiled over (dst-row tile i, src-node K tile k)."""
    i = pl.program_id(0)
    k = pl.program_id(1)

    @pl.when(k == 0)
    def _():
        acc_ref[...] = jnp.zeros_like(acc_ref)

    # Partial neighbor SUM:  E[i-tile, k-tile] @ h[k-tile]
    # E is a 0/1 mask (exact in bf16), accumulation in f32 on the MXU.
    acc_ref[...] += jnp.dot(e_ref[...], h_src_ref[...],
                            preferred_element_type=jnp.float32)

    @pl.when(k == pl.num_programs(1) - 1)
    def _():
        # Exact mean: scale the f32 sum by the f32 1/in_deg row vector (VPU).
        h_n = (acc_ref[...] * inv_deg_ref[...]).astype(jnp.bfloat16)

        # Linear(concat([h, h_N])) == h @ W_self + h_N @ W_neigh + b,
        # done as two MXU dots accumulated in f32 (no concat buffer).
        z = (jnp.dot(h_self_ref[...], w_self_ref[...],
                     preferred_element_type=jnp.float32)
             + jnp.dot(h_n, w_neigh_ref[...],
                       preferred_element_type=jnp.float32)
             + b_ref[...])

        if apply_relu:
            z = jnp.maximum(z, 0.0)
        # TODO(synk): dropout is identity in eval mode; a training kernel would
        # draw a mask here via pltpu.prng_seed / pltpu.prng_random_bits.

        # Zero the padded node rows (otherwise they hold relu(bias)) so they can
        # never leak into any future node-axis reduction.
        row = i * tm + jax.lax.broadcasted_iota(jnp.int32, z.shape, 0)
        z = jnp.where(row < n_valid, z, 0.0)

        o_ref[...] = z.astype(o_ref.dtype)


def sage_layer(e, inv_deg, h, w_self, w_neigh, b, *, n_valid, apply_relu,
               out_dtype):
    """Tiled pallas_call for one SAGEConv layer on padded, pre-cast operands."""
    n_pad = e.shape[0]
    f_in_pad = h.shape[1]
    f_out_pad = w_self.shape[1]

    # Destination-row / source-K tile sizes (MXU-friendly, modest VMEM).
    tm = 256 if n_pad % 256 == 0 else 128
    if n_pad % 512 == 0:
        tk = 512
    elif n_pad % 256 == 0:
        tk = 256
    else:
        tk = 128
    grid = (n_pad // tm, n_pad // tk)

    kernel = functools.partial(sage_layer_kernel, tm=tm, n_valid=n_valid,
                               apply_relu=apply_relu)

    return pl.pallas_call(
        kernel,
        out_shape=jax.ShapeDtypeStruct((n_pad, f_out_pad), out_dtype),
        grid_spec=pltpu.PrefetchScalarGridSpec(
            num_scalar_prefetch=0,
            grid=grid,
            in_specs=[
                pl.BlockSpec((tm, tk), lambda i, k: (i, k)),           # E tile
                pl.BlockSpec((tm, 1), lambda i, k: (i, 0)),            # 1/deg rows
                pl.BlockSpec((tm, f_in_pad), lambda i, k: (i, 0)),     # h self rows
                pl.BlockSpec((tk, f_in_pad), lambda i, k: (k, 0)),     # h source K-slice
                pl.BlockSpec((f_in_pad, f_out_pad), lambda i, k: (0, 0)),  # W_self
                pl.BlockSpec((f_in_pad, f_out_pad), lambda i, k: (0, 0)),  # W_neigh
                pl.BlockSpec((1, f_out_pad), lambda i, k: (0, 0)),         # bias
            ],
            out_specs=pl.BlockSpec((tm, f_out_pad), lambda i, k: (i, 0)),
            scratch_shapes=[pltpu.VMEM((tm, f_in_pad), jnp.float32)],   # f32 acc
        ),
        compiler_params=pltpu.CompilerParams(
            dimension_semantics=("parallel", "arbitrary")),
    )(e, inv_deg, h, h, w_self, w_neigh, b)


def graphsage_forward(edge_masks, feat, params):
    """Pad to MXU shapes, pre-cast MXU operands to bf16, run the per-layer
    tiled kernels, strip padding."""
    L = len(params)
    n, f_in = feat.shape
    n_pad = _round_up(n, LANE)          # node dim padded to 128
    f_in_pad = _round_up(f_in, LANE)

    h = jnp.zeros((n_pad, f_in_pad), jnp.bfloat16).at[:n, :f_in].set(
        feat.astype(jnp.bfloat16))

    e_padded, inv_degs = [], []
    for e in edge_masks[:L]:
        ep = jnp.zeros((n_pad, n_pad), jnp.bfloat16).at[:n, :n].set(
            e.astype(jnp.bfloat16))                      # 0/1 exact in bf16
        deg = jnp.sum(e, axis=1, keepdims=True)
        idg = jnp.where(deg > 0, 1.0 / jnp.maximum(deg, 1.0),
                        0.0).astype(jnp.float32)
        e_padded.append(ep)
        inv_degs.append(jnp.zeros((n_pad, 1), jnp.float32).at[:n].set(idg))

    wb = []
    for (w_self, w_neigh, b) in params:
        fi, fo = w_self.shape
        fi_p, fo_p = _round_up(fi, LANE), _round_up(fo, LANE)
        ws = jnp.zeros((fi_p, fo_p), jnp.bfloat16).at[:fi, :fo].set(
            w_self.astype(jnp.bfloat16))
        wn = jnp.zeros((fi_p, fo_p), jnp.bfloat16).at[:fi, :fo].set(
            w_neigh.astype(jnp.bfloat16))
        bp = jnp.zeros((1, fo_p), jnp.float32).at[:, :fo].set(b)
        wb.append((ws, wn, bp))

    for l in range(L):
        last = (l == L - 1)
        ws, wn, bp = wb[l]
        h = sage_layer(e_padded[l], inv_degs[l], h, ws, wn, bp,
                       n_valid=n, apply_relu=not last,
                       out_dtype=jnp.float32 if last else jnp.bfloat16)

    f_out = params[-1][0].shape[1]
    return h[:n, :f_out]


def init_params(key, in_feats, n_hidden, n_classes, n_layers):
    """Each layer owns Linear(2*f_in -> f_out); stored split as (W_self, W_neigh, b)."""
    dims = []
    if n_layers > 1:
        dims.append((in_feats, n_hidden))
        for _ in range(1, n_layers - 1):
            dims.append((n_hidden, n_hidden))
        dims.append((n_hidden, n_classes))
    else:
        dims.append((in_feats, n_classes))

    params = []
    for (f_in, f_out) in dims:
        key, kw, kb = jax.random.split(key, 3)
        scale = 1.0 / jnp.sqrt(2.0 * f_in)
        # PyTorch Linear weight is (f_out, 2*f_in); we build W.T = (2*f_in, f_out).
        w_t = jax.random.uniform(kw, (2 * f_in, f_out), jnp.float32,
                                 minval=-scale, maxval=scale)
        b = jax.random.uniform(kb, (1, f_out), jnp.float32,
                               minval=-scale, maxval=scale)
        params.append((w_t[:f_in], w_t[f_in:], b))
    return params


def make_edge_mask(key, n_nodes):
    """Random directed graph as a dense 0/1 mask E[i, j] = 1 iff edge j->i."""
    return jax.random.bernoulli(key, p=0.3,
                                shape=(n_nodes, n_nodes)).astype(jnp.float32)


def reference_forward(edge_masks, feat, params):
    """Pure-JAX f32 reference of Model.forward (eval mode)."""
    h = feat
    L = len(params)
    for l, (e, (w_self, w_neigh, b)) in enumerate(zip(edge_masks, params)):
        deg = jnp.sum(e, axis=1, keepdims=True)
        h_n = jnp.where(deg > 0, (e @ h) / jnp.maximum(deg, 1.0), 0.0)
        h = h @ w_self + h_n @ w_neigh + b
        if l != L - 1:
            h = jnp.maximum(h, 0.0)
    return h


if __name__ == "__main__":
    N = 64            # number of nodes (same node set used for every block)
    in_feats = 16
    n_hidden = 32
    n_classes = 8
    n_layers = 2      # SAGEConv(in->hidden) -> ReLU -> SAGEConv(hidden->classes)

    key = jax.random.PRNGKey(0)
    k_feat, k_graph0, k_graph1, k_params = jax.random.split(key, 4)

    feat = jax.random.normal(k_feat, (N, in_feats), jnp.float32)
    edge_masks = [make_edge_mask(k_graph0, N), make_edge_mask(k_graph1, N)]
    params = init_params(k_params, in_feats, n_hidden, n_classes, n_layers)

    out = graphsage_forward(edge_masks, feat, params)
    out = jax.block_until_ready(out)

    assert out.shape == (N, n_classes), out.shape
    assert jnp.all(jnp.isfinite(out))

    # Tolerance vs f32 reference (bf16 h/W on the MXU, f32 accumulation,
    # exact 0/1-mask aggregation with f32 1/deg scaling).
    ref = reference_forward(edge_masks, feat, params)
    assert jnp.allclose(out, ref, rtol=1e-1, atol=1e-1), \
        float(jnp.max(jnp.abs(out - ref)))

    print("KERNEL_OK")
</pallas_src>

<mosaic_0001>
module attributes {stable_mosaic.version = 11 : i64} {
  func.func @sage_layer_kernel(%arg0: i32, %arg1: i32, %arg2: memref<128x128xbf16, #tpu.memory_space<vmem>>, %arg3: memref<128x1xf32, #tpu.memory_space<vmem>>, %arg4: memref<128x128xbf16, #tpu.memory_space<vmem>>, %arg5: memref<128x128xbf16, #tpu.memory_space<vmem>>, %arg6: memref<128x128xbf16, #tpu.memory_space<vmem>>, %arg7: memref<128x128xbf16, #tpu.memory_space<vmem>>, %arg8: memref<1x128xf32, #tpu.memory_space<vmem>>, %arg9: memref<128x128xbf16, #tpu.memory_space<vmem>>, %arg10: memref<128x128xf32, #tpu.memory_space<vmem>>) attributes {dimension_semantics = [#tpu.dimension_semantics<parallel>, #tpu.dimension_semantics<arbitrary>], iteration_bounds = array<i64: 1, 1>, scalar_prefetch = 0 : i64, scratch_operands = 1 : i64, tpu.core_type = #tpu.core_type<tc>, window_params = [{transform_indices = @transform_0, window_bounds = array<i64: 128, 128>}, {transform_indices = @transform_1, window_bounds = array<i64: 128, 1>}, {transform_indices = @transform_2, window_bounds = array<i64: 128, 128>}, {transform_indices = @transform_3, window_bounds = array<i64: 128, 128>}, {pipeline_mode = #tpu.pipeline_mode<synchronous>, transform_indices = @transform_4, window_bounds = array<i64: 128, 128>}, {pipeline_mode = #tpu.pipeline_mode<synchronous>, transform_indices = @transform_5, window_bounds = array<i64: 128, 128>}, {pipeline_mode = #tpu.pipeline_mode<synchronous>, transform_indices = @transform_6, window_bounds = array<i64: 1, 128>}, {transform_indices = @transform_7, window_bounds = array<i64: 128, 128>}]} {
    %c0_i32 = arith.constant 0 : i32
    %0 = arith.cmpi eq, %arg1, %c0_i32 : i32
    %1 = arith.extui %0 : i1 to i32
    %c0_i32_0 = arith.constant 0 : i32
    %2 = arith.cmpi ne, %1, %c0_i32_0 : i32
    scf.if %2 {
      %cst_10 = arith.constant 0.000000e+00 : f32
      %12 = vector.broadcast %cst_10 : f32 to vector<128x128xf32>
      %c0_11 = arith.constant 0 : index
      %c0_12 = arith.constant 0 : index
      %13 = vector.load %arg10[%c0_11, %c0_12] : memref<128x128xf32, #tpu.memory_space<vmem>>, vector<128x128xf32>
      tpu.vector_store %arg10[%c0_11, %c0_12], %12 {strides = array<i32>} : memref<128x128xf32, #tpu.memory_space<vmem>>, vector<128x128xf32>,
    } else {
    }
    %c0 = arith.constant 0 : index
    %c0_1 = arith.constant 0 : index
    %3 = vector.load %arg10[%c0, %c0_1] : memref<128x128xf32, #tpu.memory_space<vmem>>, vector<128x128xf32>
    %c0_2 = arith.constant 0 : index
    %c0_3 = arith.constant 0 : index
    %4 = vector.load %arg2[%c0_2, %c0_3] : memref<128x128xbf16, #tpu.memory_space<vmem>>, vector<128x128xbf16>
    %c0_4 = arith.constant 0 : index
    %c0_5 = arith.constant 0 : index
    %5 = vector.load %arg5[%c0_4, %c0_5] : memref<128x128xbf16, #tpu.memory_space<vmem>>, vector<128x128xbf16>
    %cst = arith.constant dense<0.000000e+00> : vector<128x128xf32>
    %6 = tpu.matmul %4, %5, %cst {dimension_numbers = #tpu.dot_dimension_numbers<[1], [0], [0], [1], [0, 0, 1, 1], [], []>} : vector<128x128xbf16>, vector<128x128xbf16>, vector<128x128xf32> -> vector<128x128xf32>
    %7 = arith.addf %3, %6 : vector<128x128xf32>
    %c0_6 = arith.constant 0 : index
    %c0_7 = arith.constant 0 : index
    %8 = vector.load %arg10[%c0_6, %c0_7] : memref<128x128xf32, #tpu.memory_space<vmem>>, vector<128x128xf32>
    tpu.vector_store %arg10[%c0_6, %c0_7], %7 {strides = array<i32>} : memref<128x128xf32, #tpu.memory_space<vmem>>, vector<128x128xf32>,
    %c0_i32_8 = arith.constant 0 : i32
    %9 = arith.cmpi eq, %arg1, %c0_i32_8 : i32
    %10 = arith.extui %9 : i1 to i32
    %c0_i32_9 = arith.constant 0 : i32
    %11 = arith.cmpi ne, %10, %c0_i32_9 : i32
    scf.if %11 {
      %c0_10 = arith.constant 0 : index
      %c0_11 = arith.constant 0 : index
      %12 = vector.load %arg10[%c0_10, %c0_11] : memref<128x128xf32, #tpu.memory_space<vmem>>, vector<128x128xf32>
      %c0_12 = arith.constant 0 : index
      %c0_13 = arith.constant 0 : index
      %13 = vector.load %arg3[%c0_12, %c0_13] : memref<128x1xf32, #tpu.memory_space<vmem>>, vector<128x1xf32>
      %14 = vector.broadcast %13 : vector<128x1xf32> to vector<128x128xf32>
      %15 = arith.mulf %12, %14 : vector<128x128xf32>
      %16 = arith.truncf %15 : vector<128x128xf32> to vector<128x128xbf16>
      %c0_14 = arith.constant 0 : index
      %c0_15 = arith.constant 0 : index
      %17 = vector.load %arg4[%c0_14, %c0_15] : memref<128x128xbf16, #tpu.memory_space<vmem>>, vector<128x128xbf16>
      %c0_16 = arith.constant 0 : index
      %c0_17 = arith.constant 0 : index
      %18 = vector.load %arg6[%c0_16, %c0_17] : memref<128x128xbf16, #tpu.memory_space<vmem>>, vector<128x128xbf16>
      %cst_18 = arith.constant dense<0.000000e+00> : vector<128x128xf32>
      %19 = tpu.matmul %17, %18, %cst_18 {dimension_numbers = #tpu.dot_dimension_numbers<[1], [0], [0], [1], [0, 0, 1, 1], [], []>} : vector<128x128xbf16>, vector<128x128xbf16>, vector<128x128xf32> -> vector<128x128xf32>
      %c0_19 = arith.constant 0 : index
      %c0_20 = arith.constant 0 : index
      %20 = vector.load %arg7[%c0_19, %c0_20] : memref<128x128xbf16, #tpu.memory_space<vmem>>, vector<128x128xbf16>
      %cst_21 = arith.constant dense<0.000000e+00> : vector<128x128xf32>
      %21 = tpu.matmul %16, %20, %cst_21 {dimension_numbers = #tpu.dot_dimension_numbers<[1], [0], [0], [1], [0, 0, 1, 1], [], []>} : vector<128x128xbf16>, vector<128x128xbf16>, vector<128x128xf32> -> vector<128x128xf32>
      %22 = arith.addf %19, %21 : vector<128x128xf32>
      %c0_22 = arith.constant 0 : index
      %c0_23 = arith.constant 0 : index
      %23 = vector.load %arg8[%c0_22, %c0_23] : memref<1x128xf32, #tpu.memory_space<vmem>>, vector<1x128xf32>
      %24 = vector.broadcast %23 : vector<1x128xf32> to vector<128x128xf32>
      %25 = arith.addf %22, %24 : vector<128x128xf32>
      %cst_24 = arith.constant 0.000000e+00 : f32
      %26 = vector.broadcast %cst_24 : f32 to vector<128x128xf32>
      %27 = arith.maximumf %25, %26 : vector<128x128xf32>
      %c128_i32 = arith.constant 128 : i32
      %28 = arith.muli %arg0, %c128_i32 : i32
      %29 = tpu.iota {dimensions = array<i32: 0>} : vector<128x128xi32>
      %30 = vector.broadcast %28 : i32 to vector<128x128xi32>
      %31 = arith.addi %30, %29 : vector<128x128xi32>
      %c64_i32 = arith.constant 64 : i32
      %32 = vector.broadcast %c64_i32 : i32 to vector<128x128xi32>
      %33 = arith.cmpi slt, %31, %32 : vector<128x128xi32>
      %cst_25 = arith.constant 0.000000e+00 : f32
      %34 = vector.broadcast %cst_25 : f32 to vector<128x128xf32>
      %35 = arith.select %33, %27, %34 : vector<128x128xi1>, vector<128x128xf32>
      %36 = arith.truncf %35 : vector<128x128xf32> to vector<128x128xbf16>
      %c0_26 = arith.constant 0 : index
      %c0_27 = arith.constant 0 : index
      %37 = vector.load %arg9[%c0_26, %c0_27] : memref<128x128xbf16, #tpu.memory_space<vmem>>, vector<128x128xbf16>
      tpu.vector_store %arg9[%c0_26, %c0_27], %36 {strides = array<i32>} : memref<128x128xbf16, #tpu.memory_space<vmem>>, vector<128x128xbf16>,
    } else {
    }
    return
  }
  func.func @transform_0(%arg0: i32, %arg1: i32) -> (i32, i32) {
    %c0_i32 = arith.constant 0 : i32
    return %arg0, %arg1 : i32, i32
  }
  func.func @transform_1(%arg0: i32, %arg1: i32) -> (i32, i32) {
    %c0_i32 = arith.constant 0 : i32
    %c0_i32_0 = arith.constant 0 : i32
    return %arg0, %c0_i32 : i32, i32
  }
  func.func @transform_2(%arg0: i32, %arg1: i32) -> (i32, i32) {
    %c0_i32 = arith.constant 0 : i32
    %c0_i32_0 = arith.constant 0 : i32
    return %arg0, %c0_i32 : i32, i32
  }
  func.func @transform_3(%arg0: i32, %arg1: i32) -> (i32, i32) {
    %c0_i32 = arith.constant 0 : i32
    %c0_i32_0 = arith.constant 0 : i32
    return %arg1, %c0_i32 : i32, i32
  }
  func.func @transform_4(%arg0: i32, %arg1: i32) -> (i32, i32) {
    %c0_i32 = arith.constant 0 : i32
    %c0_i32_0 = arith.constant 0 : i32
    %c0_i32_1 = arith.constant 0 : i32
    return %c0_i32, %c0_i32_0 : i32, i32
  }
  func.func @transform_5(%arg0: i32, %arg1: i32) -> (i32, i32) {
    %c0_i32 = arith.constant 0 : i32
    %c0_i32_0 = arith.constant 0 : i32
    %c0_i32_1 = arith.constant 0 : i32
    return %c0_i32, %c0_i32_0 : i32, i32
  }
  func.func @transform_6(%arg0: i32, %arg1: i32) -> (i32, i32) {
    %c0_i32 = arith.constant 0 : i32
    %c0_i32_0 = arith.constant 0 : i32
    %c0_i32_1 = arith.constant 0 : i32
    return %c0_i32, %c0_i32_0 : i32, i32
  }
  func.func @transform_7(%arg0: i32, %arg1: i32) -> (i32, i32) {
    %c0_i32 = arith.constant 0 : i32
    %c0_i32_0 = arith.constant 0 : i32
    return %arg0, %c0_i32 : i32, i32
  }
}

</mosaic_0001>

<bundles_post_ra>
// kernel: tpu_custom_call.1
= control target key start
LH: loop header
LB: loop body
LE: loop exit
PB: predicated region body
PF: predicated region fallthrough
CT: control target
= control target key end

     0   :  { %12 = vsyncpa [#allocation4], 0  ;;  %s1459_s0 = inlined_call_operand.vmem [shape: bf16[128,128], index: 0, kind: input, shape index: {}]   ;;  %s1460_s1 = inlined_call_operand.vmem [shape: f32[128,1], index: 1, kind: input, shape index: {}]   ;;  %s1461_s2 = inlined_call_operand.vmem [shape: bf16[128,128], index: 2, kind: input, shape index: {}]   ;;  %s1462_s3 = inlined_call_operand.hbm [shape: bf16[128,128], index: 3, kind: input, shape index: {}]   ;;  %s1463_s4 = inlined_call_operand.hbm [shape: bf16[128,128], index: 4, kind: input, shape index: {}]   ;;  %s1464_s5 = inlined_call_operand.hbm [shape: bf16[128,128], index: 5, kind: input, shape index: {}]   ;;  %s1465_s6 = inlined_call_operand.vmem [shape: f32[1,128], index: 6, kind: input, shape index: {}]   ;;  %s1466_s7 = inlined_call_operand.hbm [shape: bf16[128,128], index: 7, kind: output, shape index: {}]  }
   0x1   :  { %13 = vsyncpa [#allocation7], 0 }
   0x2   :  { %14 = vsyncpa [#allocation5], 0  ;;  %s38_s26 = sshll.u32 %s1463_s4, 4  ;;  %s1288_s27 = smov [#allocation6]   ;;  %s39_s26 = int_to_ptr.hbm [resolvable:$true] %s38_s26 }
   0x3   :  { %s40_s28 = sshll.u32 %s1288_s27, 4  ;;  %s25_s8 = sshll.u32 %s1462_s3, 4  ;;  %s41_s28 = int_to_ptr.vmem [resolvable:$true] %s40_s28  ;;  %s26_s8 = int_to_ptr.hbm [resolvable:$true] %s25_s8 }
   0x4   :  { %s1289_s9 = smov 64   ;;  %s1290_s10 = smov 4  }
   0x5   :  { %46 = dma.hbm_to_vmem [thread:$0]  %s39_s26, 1024, %s41_s28, [#allocation7], %s1289_s9, %s1289_s9, %s1290_s10  }
   0x6   :  { %s1291_s11 = smov [#allocation3]   ;;  %s51_s4 = sshll.u32 %s1464_s5, 4  ;;  %s52_s4 = int_to_ptr.hbm [resolvable:$true] %s51_s4 }
   0x7   :  { %s27_s12 = sshll.u32 %s1291_s11, 4  ;;  %s1292_s3 = smov [#allocation8]   ;;  %s28_s12 = int_to_ptr.vmem [resolvable:$true] %s27_s12 }
   0x8   :  { %33 = dma.hbm_to_vmem [thread:$0]  %s26_s8, 1024, %s28_s12, [#allocation4], %s1289_s9, %s1289_s9, %s1290_s10  }
   0x9   :  { %s53_s15 = sshll.u32 %s1292_s3, 4  ;;  %s54_s15 = int_to_ptr.vmem [resolvable:$true] %s53_s15 }
   0xa   :  { %59 = dma.hbm_to_vmem [thread:$0]  %s52_s4, 1024, %s54_s15, [#allocation7], %s1289_s9, %s1289_s9, %s1290_s10  }
   0xb   :  { %1282 = dma.done.wait [#allocation4], 1024  }
   0xc   :  { %1283 = vsyncadd [#allocation4], 4294966272 }
   0xd   :  { %1284 = dma.done.wait [#allocation7], 2048  }
   0xe   :  { %1285 = vsyncadd [#allocation7], 4294965248  ;;  %v1293_v0 = vmov 0   ;;  %v1078_v1 = vld [vmem:[#allocation3 + $0x38] sm:$0xff]  ;;  %v338_v2 = vld [vmem:[%s1460_s1] sm:$0xff]  ;;  %s889_s12 = sshll.u32 %s1466_s7, 4  ;;  %s890_s12 = int_to_ptr.hbm [resolvable:$true] %s889_s12 }
   0xf   :  { %1182 = vset.pattern.permute.xlu0 %v1293_v0  ;;  %1183 = vset.pattern.permute.xlu1 %v1293_v0  ;;  %v1077_v3 = vld [vmem:[#allocation3 + $0x30] sm:$0xff]  ;;  %v1076_v5 = vld [vmem:[#allocation3 + $0x28] sm:$0xff]  ;;  %v341_v7 = vld [vmem:[%s1460_s1 + $0x18] sm:$0xff] }
  0x10   :  { %1184 = vset.pattern.permute.xlu2 %v1293_v0  ;;  %356 = vperm.xlu0 %1182, %v338_v2   ;;  %v340_v4 = vld [vmem:[%s1460_s1 + $0x10] sm:$0xff]  ;;  %v339_v6 = vld [vmem:[%s1460_s1 + $0x8] sm:$0xff]  ;;  %v1075_v8 = vld [vmem:[#allocation3 + $0x20] sm:$0xff] }
  0x11   :  { %238 = vmatpush.bf16.msra.mxu0 %v1078_v1  ;;  %1150 = vmatpush.bf16.msra.mxu3 %v1078_v1  ;;  %v1074_v9 = vld [vmem:[#allocation3 + $0x18] sm:$0xff]  ;;  %v342_v10 = vld [vmem:[%s1460_s1 + $0x20] sm:$0xff]  ;;  %v343_v11 = vld [vmem:[%s1460_s1 + $0x28] sm:$0xff] }
  0x12   :  { %366 = vperm.xlu1 %1183, %v340_v4   ;;  %v350_v12 = vld [vmem:[%s1460_s1 + $0x60] sm:$0xff]  ;;  %v1073_v13 = vld [vmem:[#allocation3 + $0x10] sm:$0xff]  ;;  %v1072_v14 = vld [vmem:[#allocation3 + $0x8] sm:$0xff] }
  0x13   :  { %416 = vperm.xlu2 %1184, %v350_v12   ;;  %v353_v15 = vld [vmem:[%s1460_s1 + $0x78] sm:$0xff]  ;;  %v344_v16 = vld [vmem:[%s1460_s1 + $0x30] sm:$0xff]  ;;  %v1071_v17 = vld [vmem:[#allocation3] sm:$0xff] }
  0x14   :  { %v1063_v18 = vld [vmem:[%s1459_s0] sm:$0xff]  ;;  %v1069_v19 = vld [vmem:[%s1459_s0 + $0x30] sm:$0xff]  ;;  %v347_v21 = vld [vmem:[%s1460_s1 + $0x48] sm:$0xff] }
  0x15   :  { %239 = vmatpush.bf16.msra.mxu0 %v1077_v3  ;;  %1151 = vmatpush.bf16.msra.mxu3 %v1077_v3  ;;  %v346_v20 = vld [vmem:[%s1460_s1 + $0x40] sm:$0xff]  ;;  %v351_v22 = vld [vmem:[%s1460_s1 + $0x68] sm:$0xff]  ;;  %v349_v23 = vld [vmem:[%s1460_s1 + $0x58] sm:$0xff] }
  0x16   :  { %v352_v24 = vld [vmem:[%s1460_s1 + $0x70] sm:$0xff]  ;;  %v1064_v25 = vld [vmem:[%s1459_s0 + $0x8] sm:$0xff]  ;;  %v1070_v26 = vld [vmem:[%s1459_s0 + $0x38] sm:$0xff] }
  0x17   :  { %v345_v27 = vld [vmem:[%s1460_s1 + $0x38] sm:$0xff]  ;;  %v348_v28 = vld [vmem:[%s1460_s1 + $0x50] sm:$0xff]  ;;  %v1067_v33 = vld [vmem:[%s1459_s0 + $0x20] sm:$0xff] }
  0x18   :  { %361 = vperm.xlu0 %1182, %v339_v6   ;;  %v1065_v29 = vld [vmem:[%s1459_s0 + $0x10] sm:$0xff]  ;;  %v1066_v30 = vld [vmem:[%s1459_s0 + $0x18] sm:$0xff]  ;;  %v1092_v34 = vld [vmem:[#allocation6 + $0x28] sm:$0xff] }
  0x19   :  { %240 = vmatpush.bf16.msra.mxu0 %v1076_v5  ;;  %1152 = vmatpush.bf16.msra.mxu3 %v1076_v5  ;;  %v1094_v31 = vld [vmem:[#allocation6 + $0x38] sm:$0xff]  ;;  %v1093_v32 = vld [vmem:[#allocation6 + $0x30] sm:$0xff]  ;;  %v1091_v35 = vld [vmem:[#allocation6 + $0x20] sm:$0xff] }
  0x1a   :  { %371 = vperm.xlu1 %1183, %v341_v7   ;;  %699 = vmatpush.bf16.msra.mxu2 %v1094_v31  ;;  %v1102_v36 = vld [vmem:[#allocation8 + $0x38] sm:$0xff]  ;;  %v1101_v38 = vld [vmem:[#allocation8 + $0x30] sm:$0xff]  ;;  %v1068_v40 = vld [vmem:[%s1459_s0 + $0x28] sm:$0xff] }
  0x1b   :  { %421 = vperm.xlu2 %1184, %v351_v22   ;;  %554 = vmatpush.bf16.msra.mxu1 %v1102_v36  ;;  %v1090_v37 = vld [vmem:[#allocation6 + $0x18] sm:$0xff]  ;;  %v1089_v39 = vld [vmem:[#allocation6 + $0x10] sm:$0xff]  ;;  %v1100_v41 = vld [vmem:[#allocation8 + $0x28] sm:$0xff] }
  0x1c   :  { %v1088_v42 = vld [vmem:[#allocation6 + $0x8] sm:$0xff]  ;;  %v1099_v43 = vld [vmem:[#allocation8 + $0x20] sm:$0xff]  ;;  %v1098_v46 = vld [vmem:[#allocation8 + $0x18] sm:$0xff] }
  0x1d   :  { %241 = vmatpush.bf16.msra.mxu0 %v1075_v8  ;;  %1153 = vmatpush.bf16.msra.mxu3 %v1075_v8  ;;  %v1087_v44 = vld [vmem:[#allocation6] sm:$0xff]  ;;  %v1097_v47 = vld [vmem:[#allocation8 + $0x10] sm:$0xff]  ;;  %v1096_v48 = vld [vmem:[#allocation8 + $0x8] sm:$0xff] }
  0x1e   :  { %700 = vmatpush.bf16.msra.mxu2 %v1093_v32  ;;  %v1079_v45 = vld [vmem:[%s1461_s2] sm:$0xff]  ;;  %v1080_v50 = vld [vmem:[%s1461_s2 + $0x8] sm:$0xff]  ;;  %v1081_v51 = vld [vmem:[%s1461_s2 + $0x10] sm:$0xff] }
  0x1f   :  { %555 = vmatpush.bf16.msra.mxu1 %v1101_v38  ;;  %v1095_v49 = vld [vmem:[#allocation8] sm:$0xff]  ;;  %v1082_v63 = vld [vmem:[%s1461_s2 + $0x18] sm:$0xff] }
  0x20   :  { %376 = vperm.xlu0 %1182, %v342_v10  }
  0x21   :  { %242 = vmatpush.bf16.msra.mxu0 %v1074_v9  ;;  %1154 = vmatpush.bf16.msra.mxu3 %v1074_v9 }
  0x22   :  { %381 = vperm.xlu1 %1183, %v343_v11   ;;  %701 = vmatpush.bf16.msra.mxu2 %v1092_v34 }
  0x23   :  { %426 = vperm.xlu2 %1184, %v352_v24   ;;  %556 = vmatpush.bf16.msra.mxu1 %v1100_v41 }
  0x25   :  { %243 = vmatpush.bf16.msra.mxu0 %v1073_v13  ;;  %1155 = vmatpush.bf16.msra.mxu3 %v1073_v13  ;;  %v1083_v13 = vld [vmem:[%s1461_s2 + $0x20] sm:$0xff] }
  0x26   :  { %702 = vmatpush.bf16.msra.mxu2 %v1091_v35 }
  0x27   :  { %557 = vmatpush.bf16.msra.mxu1 %v1099_v43 }
  0x28   :  { %431 = vperm.xlu0 %1182, %v353_v15  }
  0x29   :  { %244 = vmatpush.bf16.msra.mxu0 %v1072_v14  ;;  %1156 = vmatpush.bf16.msra.mxu3 %v1072_v14 }
  0x2a   :  { %386 = vperm.xlu1 %1183, %v344_v16   ;;  %703 = vmatpush.bf16.msra.mxu2 %v1090_v37 }
  0x2b   :  { %391 = vperm.xlu2 %1184, %v345_v27   ;;  %558 = vmatpush.bf16.msra.mxu1 %v1098_v46 }
  0x2d   :  { %245 = vmatpush.bf16.msra.mxu0 %v1071_v17  ;;  %1157 = vmatpush.bf16.msra.mxu3 %v1071_v17 }
  0x2e   :  { %704 = vmatpush.bf16.msra.mxu2 %v1089_v39 }
  0x2f   :  { %559 = vmatpush.bf16.msra.mxu1 %v1097_v47 }
  0x30   :  { %246 = vmatmul.bf16.vlgmr.msra.gmra.mxu0 %v1063_v18  ;;  %276 = vmatmul.bf16.vlgmr.msra.gmra.mxu3 %v1069_v19 }
  0x31   :  { %396 = vperm.xlu0 %1182, %v346_v20   ;;  %1158 = vmatpush.bf16.msrb.mxu3 %v1102_v36 }
  0x32   :  { %401 = vperm.xlu1 %1183, %v347_v21   ;;  %705 = vmatpush.bf16.msra.mxu2 %v1088_v42 }
  0x33   :  { %406 = vperm.xlu2 %1184, %v348_v28   ;;  %560 = vmatpush.bf16.msra.mxu1 %v1096_v48 }
  0x35   :  { %1159 = vmatpush.bf16.msrb.mxu3 %v1101_v38 }
  0x36   :  { %706 = vmatpush.bf16.msra.mxu2 %v1087_v44 }
  0x37   :  { %561 = vmatpush.bf16.msra.mxu1 %v1095_v49 }
  0x39   :  { %411 = vperm.xlu0 %1182, %v349_v23   ;;  %1160 = vmatpush.bf16.msrb.mxu3 %v1100_v41 }
  0x3a   :  { %707 = vmatmul.bf16.vlgmr.msra.gmra.mxu2 %v1079_v45 }
  0x3d   :  { %1161 = vmatpush.bf16.msrb.mxu3 %v1099_v43 }
  0x40   :  { %251 = vmatmul.bf16.gmra.mxu0 %v1064_v25  ;;  %281 = vmatmul.bf16.gmra.mxu3 %v1070_v26  ;;  %v1084_v25 = vld [vmem:[%s1461_s2 + $0x28] sm:$0xff]  ;;  %v1085_v26 = vld [vmem:[%s1461_s2 + $0x30] sm:$0xff] }
  0x41   :  { %1162 = vmatpush.bf16.msrb.mxu3 %v1098_v46 }
  0x45   :  { %1163 = vmatpush.bf16.msrb.mxu3 %v1097_v47 }
  0x49   :  { %1164 = vmatpush.bf16.msrb.mxu3 %v1096_v48 }
  0x4a   :  { %712 = vmatmul.bf16.gmra.mxu2 %v1080_v50 }
  0x4d   :  { %1165 = vmatpush.bf16.msrb.mxu3 %v1095_v49 }
  0x50   :  { %256 = vmatmul.bf16.gmra.mxu0 %v1065_v29 }
  0x51   :  { %1166 = vmatpush.bf16.msra.mxu3 %v1094_v31 }
  0x55   :  { %1167 = vmatpush.bf16.msra.mxu3 %v1093_v32 }
  0x59   :  { %1168 = vmatpush.bf16.msra.mxu3 %v1092_v34  ;;  %v1086_v34 = vld [vmem:[%s1461_s2 + $0x38] sm:$0xff] }
  0x5a   :  { %717 = vmatmul.bf16.gmra.mxu2 %v1081_v51 }
  0x5d   :  { %1169 = vmatpush.bf16.msra.mxu3 %v1091_v35 }
  0x60   :  { %261 = vmatmul.bf16.gmra.mxu0 %v1066_v30 }
  0x61   :  { %1170 = vmatpush.bf16.msra.mxu3 %v1090_v37 }
  0x65   :  { %1171 = vmatpush.bf16.msra.mxu3 %v1089_v39 }
  0x69   :  { %1172 = vmatpush.bf16.msra.mxu3 %v1088_v42 }
  0x6a   :  { %722 = vmatmul.bf16.gmra.mxu2 %v1082_v63 }
  0x6d   :  { %v417_v54 = vpop.permute.xlu2 %416  ;;  %1173 = vmatpush.bf16.msra.mxu3 %v1087_v44 }
  0x70   :  { %266 = vmatmul.bf16.gmra.mxu0 %v1067_v33 }
  0x75   :  { %v422_v0 = vpop.permute.xlu2 %421 }
  0x7a   :  { %727 = vmatmul.bf16.gmra.mxu2 %v1083_v13 }
  0x7d   :  { %v427_v12 = vpop.permute.xlu2 %426 }
  0x80   :  { %271 = vmatmul.bf16.gmra.mxu0 %v1068_v40 }
  0x82   :  { %v357_v52 = vpop.permute.xlu0 %356 }
  0x84   :  { %v367_v61 = vpop.permute.xlu1 %366 }
  0x85   :  { %v392_v29 = vpop.permute.xlu2 %391 }
  0x8a   :  { %v362_v56 = vpop.permute.xlu0 %361  ;;  %732 = vmatmul.bf16.gmra.mxu2 %v1084_v25 }
  0x8c   :  { %v372_v7 = vpop.permute.xlu1 %371 }
  0x8d   :  { %v407_v43 = vpop.permute.xlu2 %406 }
  0x92   :  { %v377_v5 = vpop.permute.xlu0 %376 }
  0x94   :  { %v382_v20 = vpop.permute.xlu1 %381 }
  0x9a   :  { %v432_v14 = vpop.permute.xlu0 %431 }
  0x9c   :  { %v387_v28 = vpop.permute.xlu1 %386 }
  0xa3   :  { %v397_v36 = vpop.permute.xlu0 %396 }
  0xa4   :  { %v402_v37 = vpop.permute.xlu1 %401 }
  0xab   :  { %v412_v44 = vpop.permute.xlu0 %411 }
  0xad   :  { %v247_v53 = vpop.f32.mrf.mxu0 }
  0xae   :  { %v434_v58 = vmul.f32 %v357_v52, %v247_v53 }
  0xb3   :  { %v277_v55 = vpop.f32.mrf.mxu3 }
  0xb4   :  { %v446_v62 = vmul.f32 %v417_v54, %v277_v55 }
  0xb5   :  { %v249_v57 = vpop.f32.mrf.mxu0 }
  0xb6   :  { %v435_v59 = vmul.f32 %v362_v56, %v249_v57  ;;  %v1185_v57 = vld [vmem:[%s1465_s6] ss:$0 sm:$0xff]  ;;  %s1295_s6 = smov [#allocation9]  }
  0xb7   :  { %s887_s30 = sshll.u32 %s1295_s6, 4  ;;  %s888_s30 = int_to_ptr.vmem [resolvable:$true] %s887_s30 }
  0xb8   :  { %v450_v60 = vpack.c.bf16 %v435_v59, %v434_v58 }
  0xba   :  { %562 = vmatmul.bf16.vlgmr.msra.gmra.mxu1 %v450_v60 }
  0xbb   :  { %v279_v1 = vpop.f32.mrf.mxu3 }
  0xbc   :  { %v447_v2 = vmul.f32 %v422_v0, %v279_v1 }
  0xbd   :  { %v252_v3 = vpop.f32.mrf.mxu0  ;;  %v708_v49 = vpop.f32.mrf.mxu2 }
  0xbe   :  { %v456_v4 = vpack.c.bf16 %v447_v2, %v446_v62  ;;  %v436_v9 = vmul.f32 %v367_v61, %v252_v3 }
  0xc0   :  { %592 = vmatmul.bf16.vlgmr.msrb.gmra.mxu3 %v456_v4 }
  0xc3   :  { %v282_v6 = vpop.f32.mrf.mxu3 }
  0xc4   :  { %v448_v16 = vmul.f32 %v427_v12, %v282_v6 }
  0xc5   :  { %v254_v8 = vpop.f32.mrf.mxu0  ;;  %v710_v50 = vpop.f32.mrf.mxu2 }
  0xc6   :  { %v437_v10 = vmul.f32 %v372_v7, %v254_v8 }
  0xc8   :  { %v451_v11 = vpack.c.bf16 %v437_v10, %v436_v9 }
  0xca   :  { %567 = vmatmul.bf16.gmra.mxu1 %v451_v11 }
  0xcb   :  { %v284_v15 = vpop.f32.mrf.mxu3 }
  0xcc   :  { %v449_v17 = vmul.f32 %v432_v14, %v284_v15 }
  0xcd   :  { %v257_v18 = vpop.f32.mrf.mxu0  ;;  %v713_v51 = vpop.f32.mrf.mxu2 }
  0xce   :  { %v457_v19 = vpack.c.bf16 %v449_v17, %v448_v16  ;;  %v438_v22 = vmul.f32 %v377_v5, %v257_v18 }
  0xd0   :  { %597 = vmatmul.bf16.gmra.mxu3 %v457_v19 }
  0xd5   :  { %v259_v21 = vpop.f32.mrf.mxu0  ;;  %v715_v52 = vpop.f32.mrf.mxu2 }
  0xd6   :  { %v439_v23 = vmul.f32 %v382_v20, %v259_v21 }
  0xd8   :  { %v452_v24 = vpack.c.bf16 %v439_v23, %v438_v22 }
  0xda   :  { %572 = vmatmul.bf16.gmra.mxu1 %v452_v24 }
  0xdd   :  { %v262_v27 = vpop.f32.mrf.mxu0  ;;  %v718_v53 = vpop.f32.mrf.mxu2 }
  0xde   :  { %v440_v31 = vmul.f32 %v387_v28, %v262_v27 }
  0xe0   :  { %737 = vmatmul.bf16.vlgmr.msra.gmra.mxu3 %v1085_v26 }
  0xe5   :  { %v264_v30 = vpop.f32.mrf.mxu0  ;;  %v720_v55 = vpop.f32.mrf.mxu2 }
  0xe6   :  { %v441_v32 = vmul.f32 %v392_v29, %v264_v30 }
  0xe8   :  { %v453_v33 = vpack.c.bf16 %v441_v32, %v440_v31  ;;  %v1294_v31 = vmov 0.0|0.0  }
  0xe9   :  { %v1124_v32 = vunpack.c.l.bf16 %v1294_v31 }
  0xea   :  { %577 = vmatmul.bf16.gmra.mxu1 %v453_v33 }
  0xed   :  { %v267_v35 = vpop.f32.mrf.mxu0  ;;  %v723_v59 = vpop.f32.mrf.mxu2 }
  0xee   :  { %v442_v39 = vmul.f32 %v397_v36, %v267_v35  ;;  %v1126_v35 = vpack.c.bf16 %v1124_v32, %v1124_v32 }
  0xf0   :  { %742 = vmatmul.bf16.gmra.mxu3 %v1086_v34  ;;  %1146 = vst [vmem:[#allocation9 + $0x20] sm:$0xff] %v1126_v35  }
  0xf1   :  { %1147 = vst [vmem:[#allocation9 + $0x28] sm:$0xff] %v1126_v35  }
  0xf2   :  { %1148 = vst [vmem:[#allocation9 + $0x30] sm:$0xff] %v1126_v35  }
  0xf3   :  { %1149 = vst [vmem:[#allocation9 + $0x38] sm:$0xff] %v1126_v35  }
  0xf5   :  { %v269_v38 = vpop.f32.mrf.mxu0  ;;  %v725_v4 = vpop.f32.mrf.mxu2 }
  0xf6   :  { %v443_v40 = vmul.f32 %v402_v37, %v269_v38 }
  0xf8   :  { %v454_v41 = vpack.c.bf16 %v443_v40, %v442_v39 }
  0xfa   :  { %582 = vmatmul.bf16.gmra.mxu1 %v454_v41 }
  0xfd   :  { %v272_v42 = vpop.f32.mrf.mxu0  ;;  %v728_v8 = vpop.f32.mrf.mxu2 }
  0xfe   :  { %v444_v46 = vmul.f32 %v407_v43, %v272_v42 }
 0x105   :  { %v274_v45 = vpop.f32.mrf.mxu0  ;;  %v730_v17 = vpop.f32.mrf.mxu2 }
 0x106   :  { %v445_v47 = vmul.f32 %v412_v44, %v274_v45 }
 0x108   :  { %v455_v48 = vpack.c.bf16 %v445_v47, %v444_v46 }
 0x10a   :  { %587 = vmatmul.bf16.gmra.mxu1 %v455_v48 }
 0x10d   :  { %v733_v21 = vpop.f32.mrf.mxu2 }
 0x115   :  { %v735_v30 = vpop.f32.mrf.mxu2 }
 0x137   :  { %v563_v54 = vpop.f32.mrf.mxu1 }
 0x138   :  { %v709_v56 = vadd.f32 %v708_v49, %v563_v54 }
 0x13a   :  { %v752_v60 = vadd.f32 %v1185_v57, %v709_v56 }
 0x13c   :  { %v768_v0 = vmax.f32 %v752_v60, 0.0 }
 0x13f   :  { %v565_v58 = vpop.f32.mrf.mxu1 }
 0x140   :  { %v711_v61 = vadd.f32 %v710_v50, %v565_v58 }
 0x142   :  { %v753_v62 = vadd.f32 %v1185_v57, %v711_v61 }
 0x143   :  { %v593_v63 = vpop.f32.mrf.mxu3 }
 0x144   :  { %v769_v1 = vmax.f32 %v753_v62, 0.0 }
 0x146   :  { %v1106_v2 = vpack.c.bf16 %v769_v1, %v768_v0 }
 0x147   :  { %v568_v3 = vpop.f32.mrf.mxu1 }
 0x148   :  { %1107 = vst [vmem:[#allocation9] sm:$0xff] %v1106_v2   ;;  %v714_v6 = vadd.f32 %v713_v51, %v568_v3 }
 0x14a   :  { %v754_v9 = vadd.f32 %v1185_v57, %v714_v6 }
 0x14b   :  { %v595_v5 = vpop.f32.mrf.mxu3 }
 0x14c   :  { %v770_v13 = vmax.f32 %v754_v9, 0.0 }
 0x14f   :  { %v570_v7 = vpop.f32.mrf.mxu1 }
 0x150   :  { %v716_v10 = vadd.f32 %v715_v52, %v570_v7 }
 0x152   :  { %v755_v11 = vadd.f32 %v1185_v57, %v716_v10 }
 0x153   :  { %v598_v12 = vpop.f32.mrf.mxu3 }
 0x154   :  { %v771_v14 = vmax.f32 %v755_v11, 0.0 }
 0x156   :  { %v1111_v15 = vpack.c.bf16 %v771_v14, %v770_v13 }
 0x157   :  { %v573_v16 = vpop.f32.mrf.mxu1 }
 0x158   :  { %1143 = vst [vmem:[#allocation9 + $0x8] sm:$0xff] %v1111_v15   ;;  %v719_v19 = vadd.f32 %v718_v53, %v573_v16 }
 0x15a   :  { %v756_v22 = vadd.f32 %v1185_v57, %v719_v19 }
 0x15b   :  { %v600_v18 = vpop.f32.mrf.mxu3 }
 0x15c   :  { %v772_v26 = vmax.f32 %v756_v22, 0.0 }
 0x15f   :  { %v575_v20 = vpop.f32.mrf.mxu1 }
 0x160   :  { %v721_v23 = vadd.f32 %v720_v55, %v575_v20 }
 0x162   :  { %v757_v24 = vadd.f32 %v1185_v57, %v721_v23 }
 0x163   :  { %v738_v25 = vpop.f32.mrf.mxu3 }
 0x164   :  { %v773_v27 = vmax.f32 %v757_v24, 0.0 }
 0x166   :  { %v1116_v28 = vpack.c.bf16 %v773_v27, %v772_v26 }
 0x167   :  { %v578_v29 = vpop.f32.mrf.mxu1 }
 0x168   :  { %1144 = vst [vmem:[#allocation9 + $0x10] sm:$0xff] %v1116_v28   ;;  %v724_v34 = vadd.f32 %v723_v59, %v578_v29 }
 0x16a   :  { %v758_v37 = vadd.f32 %v1185_v57, %v724_v34 }
 0x16b   :  { %v740_v33 = vpop.f32.mrf.mxu3 }
 0x16c   :  { %v774_v41 = vmax.f32 %v758_v37, 0.0 }
 0x16f   :  { %v580_v36 = vpop.f32.mrf.mxu1 }
 0x170   :  { %v726_v38 = vadd.f32 %v725_v4, %v580_v36 }
 0x172   :  { %v759_v39 = vadd.f32 %v1185_v57, %v726_v38 }
 0x173   :  { %v743_v40 = vpop.f32.mrf.mxu3 }
 0x174   :  { %v775_v42 = vmax.f32 %v759_v39, 0.0 }
 0x176   :  { %v1121_v43 = vpack.c.bf16 %v775_v42, %v774_v41 }
 0x177   :  { %v583_v44 = vpop.f32.mrf.mxu1 }
 0x178   :  { %1145 = vst [vmem:[#allocation9 + $0x18] sm:$0xff] %v1121_v43  }
 0x179   :  { %895 = dma.vmem_to_hbm [thread:$0]  %s888_s30, 1024, %s890_s12, [#allocation5], %s1289_s9, %s1289_s9, %s1290_s10  }
 0x17b   :  { %v745_v45 = vpop.f32.mrf.mxu3 }
 0x17f   :  { %v585_v46 = vpop.f32.mrf.mxu1 }
 0x187   :  { %v588_v47 = vpop.f32.mrf.mxu1 }
 0x18f   :  { %v590_v48 = vpop.f32.mrf.mxu1 }
 0x190   :  { %1286 = dma.done.wait [#allocation5], 1024  }
 0x191   :  { %1287 = vsyncadd [#allocation5], 4294966272 }
 0x192   :  { %900 = vsyncpa [#allocation4], 1 }
 0x193   :  { %901 = vsyncpa [#allocation7], 1 }
 0x194   :  { %902 = vsyncpa [#allocation5], 1 }

</bundles_post_ra>
